<compile_context>
chip_gen: v5e
topology: v5e:2x2
jax: 0.10.0
libtpu: 0.0.40
codegen_flags: <defaults>
</compile_context>

<pallas_src>
import functools

import jax
import jax.numpy as jnp
from jax import lax
from jax.experimental import pallas as pl
from jax.experimental.pallas import tpu as pltpu

N_EMBD = 186      # C, fixed by the module definition
BLOCK_SIZE = 200  # causal-mask buffer size (T must be <= BLOCK_SIZE)


def _head_kernel(x_ref, w_ref, o_ref, *, batch_block, seq_len, head_size):
    Bb, T, H = batch_block, seq_len, head_size

    x = x_ref[...]                     # (Bb*T, C)  bf16
    w = w_ref[...]                     # (C, WP)    bf16 = [wq | wk | wv | 0-pad]

    # Fused QKV projection: one bf16 MXU matmul with f32 accumulation, N = WP (=128 for H=32).
    qkv = jnp.dot(x, w, preferred_element_type=jnp.float32)          # (Bb*T, WP) f32

    # Packed head slots at lane offsets 0, H, 2H (static slices; the padding
    # lanes beyond 3*H are zero and never touched).
    q = qkv[:, 0 * H:1 * H].reshape(Bb, T, H).astype(jnp.bfloat16)
    k = qkv[:, 1 * H:2 * H].reshape(Bb, T, H).astype(jnp.bfloat16)
    v = qkv[:, 2 * H:3 * H].reshape(Bb, T, H).astype(jnp.bfloat16)

    # Attention scores: contract the head axis directly (no explicit K transpose),
    # bf16 operands, f32 accumulation.
    scale = jnp.float32(H ** -0.5)
    wei = lax.dot_general(q, k, dimension_numbers=(((2,), (2,)), ((0,), (0,))),
                          preferred_element_type=jnp.float32) * scale  # (Bb, T, T) f32

    # Causal mask, built once per grid step and broadcast over the Bb batch block.
    rows = lax.broadcasted_iota(jnp.int32, (T, T), 0)
    cols = lax.broadcasted_iota(jnp.int32, (T, T), 1)
    wei = jnp.where((cols <= rows)[None, :, :], wei, jnp.float32(-jnp.inf))

    # Numerically stable softmax over the last axis, all element-wise math in f32
    # (the diagonal is always kept -> no all--inf rows / NaNs).
    wei = wei - jnp.max(wei, axis=-1, keepdims=True)
    wei = jnp.exp(wei)
    wei = wei * pl.reciprocal(jnp.sum(wei, axis=-1, keepdims=True), approx=False)

    # dropout: eval mode -> identity.

    # P @ V with bf16 operands (flash-attention convention), f32 accumulation.
    out = lax.dot_general(wei.astype(jnp.bfloat16), v,
                          dimension_numbers=(((2,), (1,)), ((0,), (0,))),
                          preferred_element_type=jnp.float32)           # (Bb, T, H) f32

    # Direct (Bb*T, H) store: no padded 128-lane slab, no post-kernel slice.
    o_ref[...] = out.reshape(Bb * T, H).astype(o_ref.dtype)


def head_forward(x, wq, wk, wv, *, batch_block=None):
    """x: (B, T, C) f32; wq/wk/wv: (C, H) f32 (transposed nn.Linear weights).

    Returns (B, T, H) f32, matching Head.forward in eval mode."""
    B, T, C = x.shape
    H = wq.shape[-1]
    assert C == N_EMBD and T <= BLOCK_SIZE

    # Pad T up to a sublane multiple so flattened (Bb*T, C) blocks stay aligned.
    # Padded key columns are masked out by causality for all real rows; padded
    # query rows are dropped by the final slice.
    Tp = ((T + 7) // 8) * 8
    if Tp != T:
        x = jnp.pad(x, ((0, 0), (0, Tp - T), (0, 0)))

    # Pack wq|wk|wv into one lane-padded (C, WP) bf16 weight (zeros in padding).
    # WP = 3*H rounded up to a 128-lane tile -> for H=32 the projection N shrinks
    # from 3*128 to 128.
    WP = max(128, ((3 * H + 127) // 128) * 128)
    w_qkv = jnp.zeros((C, WP), jnp.float32)
    w_qkv = w_qkv.at[:, 0 * H:1 * H].set(wq.astype(jnp.float32))
    w_qkv = w_qkv.at[:, 1 * H:2 * H].set(wk.astype(jnp.float32))
    w_qkv = w_qkv.at[:, 2 * H:3 * H].set(wv.astype(jnp.float32))
    w_qkv = w_qkv.astype(jnp.bfloat16)

    # Batch elements per grid step: the largest divisor of B that still leaves
    # >= 2 grid steps (keeps both v7x TensorCores busy via "parallel" semantics)
    # while amortizing per-step overhead; comfortably inside scoped VMEM at
    # T <= 200 with bf16 operands.
    if batch_block is None:
        cands = [d for d in (16, 8, 4, 2, 1) if B % d == 0 and B // d >= 2]
        batch_block = cands[0] if cands else B
    Bb = batch_block
    assert B % Bb == 0

    x_flat = x.reshape(B * Tp, C).astype(jnp.bfloat16)

    kernel = functools.partial(_head_kernel, batch_block=Bb, seq_len=Tp, head_size=H)

    out_flat = pl.pallas_call(
        kernel,
        out_shape=jax.ShapeDtypeStruct((B * Tp, H), jnp.float32),
        grid_spec=pltpu.PrefetchScalarGridSpec(
            num_scalar_prefetch=0,
            grid=(B // Bb,),
            in_specs=[
                pl.BlockSpec((Bb * Tp, C), lambda b: (b, 0)),
                pl.BlockSpec((C, WP), lambda b: (0, 0)),
            ],
            out_specs=pl.BlockSpec((Bb * Tp, H), lambda b: (b, 0)),
        ),
        compiler_params=pltpu.CompilerParams(
            dimension_semantics=("parallel",),
            vmem_limit_bytes=48 * 1024 * 1024,
        ),
    )(x_flat, w_qkv)

    out = out_flat.reshape(B, Tp, H)
    if Tp != T:
        out = out[:, :T, :]
    return out


def head_reference(x, wq, wk, wv):
    """Pure-JAX f32 reference mirroring the PyTorch forward (eval-mode dropout)."""
    q = x @ wq
    k = x @ wk
    v = x @ wv
    wei = (q @ jnp.swapaxes(k, -2, -1)) * (k.shape[-1] ** -0.5)
    T = x.shape[1]
    tril = jnp.tril(jnp.ones((T, T), dtype=jnp.float32))
    wei = jnp.where(tril == 0, -jnp.inf, wei)
    wei = jax.nn.softmax(wei, axis=-1)
    return wei @ v


if __name__ == "__main__":
    B, T, C, H = 2, 16, N_EMBD, 32

    key = jax.random.PRNGKey(0)
    kx, kq, kk, kv = jax.random.split(key, 4)

    x = jax.random.normal(kx, (B, T, C), dtype=jnp.float32)
    # nn.Linear(C, H, bias=False) weights, stored transposed as (C, H) for x @ W.
    bound = 1.0 / jnp.sqrt(jnp.float32(C))
    wq = jax.random.uniform(kq, (C, H), jnp.float32, -bound, bound)
    wk = jax.random.uniform(kk, (C, H), jnp.float32, -bound, bound)
    wv = jax.random.uniform(kv, (C, H), jnp.float32, -bound, bound)

    out = head_forward(x, wq, wk, wv)
    out = jax.block_until_ready(out)

    ref = head_reference(x, wq, wk, wv)
    assert out.shape == (B, T, H)
    # Tolerance covers bf16 MXU operands (f32 accumulation) vs the f32 reference.
    assert jnp.allclose(out, ref, atol=3e-2, rtol=3e-2), "mismatch vs reference"

    print("KERNEL_OK")
</pallas_src>

<mosaic_0001>
module attributes {stable_mosaic.version = 11 : i64} {
  func.func @_head_kernel(%arg0: i32, %arg1: memref<16x186xbf16, #tpu.memory_space<vmem>>, %arg2: memref<186x128xbf16, #tpu.memory_space<vmem>>, %arg3: memref<16x32xf32, #tpu.memory_space<vmem>>) attributes {dimension_semantics = [#tpu.dimension_semantics<parallel>], iteration_bounds = array<i64: 2>, scalar_prefetch = 0 : i64, scratch_operands = 0 : i64, tpu.core_type = #tpu.core_type<tc>, window_params = [{transform_indices = @transform_0, window_bounds = array<i64: 16, 186>}, {pipeline_mode = #tpu.pipeline_mode<synchronous>, transform_indices = @transform_1, window_bounds = array<i64: 186, 128>}, {transform_indices = @transform_2, window_bounds = array<i64: 16, 32>}]} {
    %c0 = arith.constant 0 : index
    %c0_0 = arith.constant 0 : index
    %0 = vector.load %arg1[%c0, %c0_0] : memref<16x186xbf16, #tpu.memory_space<vmem>>, vector<16x186xbf16>
    %c0_1 = arith.constant 0 : index
    %c0_2 = arith.constant 0 : index
    %1 = vector.load %arg2[%c0_1, %c0_2] : memref<186x128xbf16, #tpu.memory_space<vmem>>, vector<186x128xbf16>
    %cst = arith.constant dense<0.000000e+00> : vector<16x128xf32>
    %2 = tpu.matmul %0, %1, %cst {dimension_numbers = #tpu.dot_dimension_numbers<[1], [0], [0], [1], [0, 0, 1, 1], [], []>} : vector<16x186xbf16>, vector<186x128xbf16>, vector<16x128xf32> -> vector<16x128xf32>
    %3 = vector.extract_strided_slice %2 {offsets = [0, 0], sizes = [16, 32], strides = [1, 1]} : vector<16x128xf32> to vector<16x32xf32>
    %4 = vector.shape_cast %3 : vector<16x32xf32> to vector<1x16x32xf32>
    %5 = arith.truncf %4 : vector<1x16x32xf32> to vector<1x16x32xbf16>
    %6 = vector.extract_strided_slice %2 {offsets = [0, 32], sizes = [16, 32], strides = [1, 1]} : vector<16x128xf32> to vector<16x32xf32>
    %7 = vector.shape_cast %6 : vector<16x32xf32> to vector<1x16x32xf32>
    %8 = arith.truncf %7 : vector<1x16x32xf32> to vector<1x16x32xbf16>
    %9 = vector.extract_strided_slice %2 {offsets = [0, 64], sizes = [16, 32], strides = [1, 1]} : vector<16x128xf32> to vector<16x32xf32>
    %10 = vector.shape_cast %9 : vector<16x32xf32> to vector<1x16x32xf32>
    %11 = arith.truncf %10 : vector<1x16x32xf32> to vector<1x16x32xbf16>
    %cst_3 = arith.constant dense<0.000000e+00> : vector<1x16x16xf32>
    %12 = tpu.matmul %5, %8, %cst_3 {dimension_numbers = #tpu.dot_dimension_numbers<[2], [2], [1], [1], [0, 0, 0, 1, 1, 1], [0], [0]>} : vector<1x16x32xbf16>, vector<1x16x32xbf16>, vector<1x16x16xf32> -> vector<1x16x16xf32>
    %cst_4 = arith.constant 0.176776692 : f32
    %13 = vector.broadcast %cst_4 : f32 to vector<1x16x16xf32>
    %14 = arith.mulf %12, %13 : vector<1x16x16xf32>
    %15 = tpu.iota {dimensions = array<i32: 0>} : vector<16x16xi32>
    %16 = tpu.iota {dimensions = array<i32: 1>} : vector<16x16xi32>
    %17 = arith.cmpi sle, %16, %15 : vector<16x16xi32>
    %18 = vector.shape_cast %17 : vector<16x16xi1> to vector<1x16x16xi1>
    %cst_5 = arith.constant 0xFF800000 : f32
    %19 = vector.broadcast %cst_5 : f32 to vector<1x16x16xf32>
    %20 = arith.select %18, %14, %19 : vector<1x16x16xi1>, vector<1x16x16xf32>
    %cst_6 = arith.constant dense<0xFF800000> : vector<1x16xf32>
    %21 = vector.multi_reduction <maximumf>, %20, %cst_6 [2] : vector<1x16x16xf32> to vector<1x16xf32>
    %22 = vector.shape_cast %21 : vector<1x16xf32> to vector<1x16x1xf32>
    %23 = vector.broadcast %22 : vector<1x16x1xf32> to vector<1x16x16xf32>
    %24 = arith.subf %20, %23 : vector<1x16x16xf32>
    %25 = math.exp %24 : vector<1x16x16xf32>
    %cst_7 = arith.constant dense<0.000000e+00> : vector<1x16xf32>
    %26 = vector.multi_reduction <add>, %25, %cst_7 [2] : vector<1x16x16xf32> to vector<1x16xf32>
    %27 = vector.shape_cast %26 : vector<1x16xf32> to vector<1x16x1xf32>
    %28 = tpu.reciprocal %27 : vector<1x16x1xf32> -> vector<1x16x1xf32>
    %29 = vector.broadcast %28 : vector<1x16x1xf32> to vector<1x16x16xf32>
    %30 = arith.mulf %25, %29 : vector<1x16x16xf32>
    %31 = arith.truncf %30 : vector<1x16x16xf32> to vector<1x16x16xbf16>
    %cst_8 = arith.constant dense<0.000000e+00> : vector<1x16x32xf32>
    %32 = tpu.matmul %31, %11, %cst_8 {dimension_numbers = #tpu.dot_dimension_numbers<[2], [1], [1], [2], [0, 0, 0, 1, 1, 2], [0], [0]>} : vector<1x16x16xbf16>, vector<1x16x32xbf16>, vector<1x16x32xf32> -> vector<1x16x32xf32>
    %33 = vector.shape_cast %32 : vector<1x16x32xf32> to vector<16x32xf32>
    %c0_9 = arith.constant 0 : index
    %c0_10 = arith.constant 0 : index
    %34 = vector.load %arg3[%c0_9, %c0_10] : memref<16x32xf32, #tpu.memory_space<vmem>>, vector<16x32xf32>
    tpu.vector_store %arg3[%c0_9, %c0_10], %33 {strides = array<i32>} : memref<16x32xf32, #tpu.memory_space<vmem>>, vector<16x32xf32>,
    return
  }
  func.func @transform_0(%arg0: i32) -> (i32, i32) {
    %c0_i32 = arith.constant 0 : i32
    %c0_i32_0 = arith.constant 0 : i32
    return %arg0, %c0_i32 : i32, i32
  }
  func.func @transform_1(%arg0: i32) -> (i32, i32) {
    %c0_i32 = arith.constant 0 : i32
    %c0_i32_0 = arith.constant 0 : i32
    %c0_i32_1 = arith.constant 0 : i32
    return %c0_i32, %c0_i32_0 : i32, i32
  }
  func.func @transform_2(%arg0: i32) -> (i32, i32) {
    %c0_i32 = arith.constant 0 : i32
    %c0_i32_0 = arith.constant 0 : i32
    return %arg0, %c0_i32 : i32, i32
  }
}

</mosaic_0001>

<bundles_post_ra>
// kernel: tpu_custom_call.1
= control target key start
LH: loop header
LB: loop body
LE: loop exit
PB: predicated region body
PF: predicated region fallthrough
CT: control target
= control target key end

     0   :  { %7 = vsyncpa [#allocation3], 0  ;;  %s1026_s0 = inlined_call_operand.hbm [shape: bf16[32,186], index: 0, kind: input, shape index: {}]   ;;  %s1027_s1 = inlined_call_operand.hbm [shape: bf16[186,128], index: 1, kind: input, shape index: {}]   ;;  %s1028_s2 = inlined_call_operand.hbm [shape: f32[32,32], index: 2, kind: output, shape index: {}]  }
   0x1   :  { %9 = vsyncpa [#allocation3 + $0x1], 0 }
   0x2   :  { %10 = vsyncpa [#allocation6], 0 }
   0x3   :  { %11 = vsyncpa [#allocation4], 0 }
   0x4   :  { %13 = vsyncpa [#allocation4 + $0x1], 0  ;;  %s867_s9 = smov 0   ;;  %s869_s10 = smov 0  }
   0x5   :  { %s871_s11 = smov 0   ;;  %s873_s12 = smov 0  }
   0x6 LB: > { %s888_s13 = sadd.s32 4294967295, %s841_s12   ;;  %s545_s14 = sadd.s32 4294967294, %s841_s12   ;;  %s841_s12 = sphi %s873_s12, %s1038_s12   ;;  %s837_s11 = sphi %s871_s11, %s1037_s11   ;;  %s833_s10 = sphi %s869_s10, %s1036_s10   ;;  %s829_s9 = sphi %s867_s9, %s1035_s9  }
   0x7   : > { %p39_p0 = scmp.ne.s32.totalorder %s833_s10, %s829_s9  ;;  %p40_p1 = scmp.eq.s32.totalorder %s888_s13, 0 }
   0x8   : > { %p84_p2 = scmp.eq.s32.totalorder %s888_s13, 1  ;;  %p90_p3 = scmp.eq.s32.totalorder %s545_s14, 1 }
   0x9   : > { %p897_p4 = por %p40_p1, %p39_p0  ;;  %p546_p5 = scmp.ge.s32.totalorder %s841_s12, 1 }
   0xa   : > { %p902_p6 = por %p90_p3, %p39_p0  ;;  %p97_p7 = scmp.lt.s32.totalorder %s841_s12, 3 }
   0xb   : > { %s108_s19 = sshll.u32 %s1027_s1, 4  ;;  %s843_s21 = smov [#allocation5]   ;;  %s109_s19 = int_to_ptr.hbm [resolvable:$true] %s108_s19 }
   0xc   : > { %p910_p8 = pnand %p546_p5, %p97_p7  ;;  %s110_s22 = sshll.u32 %s843_s21, 4  ;;  %s111_s22 = int_to_ptr.vmem [resolvable:$true] %s110_s22 }
   0xd   : > { %s920_s23 = sadd.s32 1, %s841_s12   ;;  %s844_s24 = smov 64  }
   0xe   : > { %p646_p9 = pneg %p910_p8  ;;  %s845_s25 = smov 4  }
   0xf   : > { %s23_s26 = ssub.s32 %s841_s12, %s920_s23  ;;  %s26_s27 = sadd.s32 1, %s837_s11 }
  0x10   : > { %p647_p10 = pnand %p646_p9, %p40_p1  ;;  %p24_p12 = scmp.eq.s32.totalorder %s23_s26, 0 }
  0x11   : > { %p33_p13 = scmp.ne.s32.totalorder %s837_s11, %s833_s10  ;;  %p34_p0 = scmp.eq.s32.totalorder %s841_s12, 0 }
  0x12   : > { %649 = dma.hbm_to_vmem [thread:$0]  (!%p647_p10), %s109_s19, 1536, %s111_s22, [#allocation6], %s844_s24, %s844_s24, %s845_s25  }
  0x13   : > { %p659_p3 = scmp.lt.s32.totalorder %s841_s12, 2  ;;  %p35_p5 = por %p34_p0, %p33_p13 }
  0x14   : > { %s930_s28 = scalar_select %p24_p12, %s837_s11, %s26_s27  }
  0x15   : > { %p934_p7 = por %p84_p2, %p33_p13  ;;  %s124_s30 = sand.u32 1, %s837_s11  }
  0x16   : > { %s622_s3 = sshll.u32 %s841_s12, 4  ;;  %s549_s4 = sshll.u32 %s124_s30, 4 }
  0x17   : > { %s134_s7 = scalar_lea.hbm %s1026_s0, %s622_s3  ;;  %s128_s14 = scalar_lea.vmem [#allocation2], %s549_s4 }
  0x18   : > { %s135_s8 = sshll.u32 %s134_s7, 4  ;;  %s137_s17 = sshll.u32 %s128_s14, 4  ;;  %s136_s8 = int_to_ptr.hbm [resolvable:$true] %s135_s8  ;;  %s138_s17 = int_to_ptr.vmem [resolvable:$true] %s137_s17 }
  0x19   : > { %p945_p9 = pnand %p659_p3, %p35_p5  ;;  %s125_s19 = scalar_lea.sflag [#allocation3], %s124_s30 }
  0x1a   : > { %s741_s21 = sshra.s32 %s136_s8, 4  ;;  %s748_s26 = scalar_lea.hbm %s1026_s0, 32  ;;  %s742_s21 = int_to_ptr.hbm [resolvable:$true] %s741_s21 }
  0x1b   : > { %s743_s22 = scalar_lea.hbm %s742_s21, 16  ;;  %p745_p10 = pneg %p945_p9 }
  0x1c   : > { %p744_p2 = scmp.ne.s32.totalorder %s742_s21, %s743_s22  ;;  %p749_p0 = scmp.lt.s32.totalorder %s742_s21, %s1026_s0 }
  0x1d   : > { %p750_p3 = scmp.lt.s32.totalorder %s748_s26, %s743_s22 }
  0x1e   : > { %p746_p12 = pnand %p745_p10, %p744_p2 }
  0x1f   : > { %p751_p5 = por %p750_p3, %p749_p0 }
  0x20   : > { %p747_p13 = pneg %p746_p12 }
  0x22   : > { %p752_p11 = pnand %p751_p5, %p747_p13 }
  0x24   : > { %755 = shalt.err (!%p752_p11)
}
  0x25   : > { %s846_s30 = smov 128   ;;  %s847_s4 = smov 8  }
  0x26   : > { %653 = dma.hbm_to_vmem [thread:$0]  (!%p945_p9), %s136_s8, 256, %s138_s17, %s125_s19, %s846_s30, %s846_s30, %s847_s4  }
  0x27   : > { %149 = sbr.rel (%p910_p8) target bundleno = 901 (0x385), region = 28  ;;  %s962_s5 = sand.u32 (!%p910_p8), 1, %s833_s10  }
  0x28   : > { %s554_s6 = sshll.u32 (!%p910_p8), %s962_s5, 4  ;;  %s152_s7 = scalar_lea.sflag (!%p910_p8), [#allocation3], %s962_s5 }
  0x29   : > { %s968_s14 = scalar_lea.vmem (!%p910_p8), [#allocation2], %s554_s6 }
  0x2c   : > { %816 = dma.done.wait (%p897_p4), %s152_s7, 256  }
  0x2d   : > { %818 = vsyncadd (%p897_p4), %s152_s7, 4294967040 }
  0x2e   : > { %820 = dma.done.wait (%p40_p1), [#allocation6], 1536  }
  0x2f   : > { %822 = vsyncadd (%p40_p1), [#allocation6], 4294965760  ;;  %v632_v0 = vld [vmem:[#allocation5 + $0x38] sm:$0xff]  ;;  %vm295_vm0 = vcmask 1044480   ;;  %v631_v3 = vld [vmem:[#allocation5 + $0x30] sm:$0xff]  ;;  %vm291_vm1 = vcmask 474112   ;;  %v359_v34 = vlaneseq }
  0x30   : > { %v611_v1 = vld [vmem:[#allocation5 + $0x58] sm:$0xf]  ;;  %v636_v2 = vld [vmem:[#allocation5 + $0x58] sm:$0x10]  ;;  %299 = vmatpush.bf16.msra.mxu0 %v632_v0  ;;  %v635_v6 = vld [vmem:[#allocation5 + $0x50] sm:$0xff]  ;;  %s848_s15 = smov 96  }
  0x31   : > { %v612_v4 = vor.u32 %v636_v2, %v611_v1  ;;  %v630_v7 = vld [vmem:[#allocation5 + $0x28] sm:$0xff]  ;;  %v629_v9 = vld [vmem:[#allocation5 + $0x20] sm:$0xff]  ;;  %v628_v13 = vld [vmem:[#allocation5 + $0x18] sm:$0xff]  ;;  %vm336_vm2 = vcmask 261120   ;;  %v360_v35 = vshrl.u32 %v359_v34, 7  ;;  %v363_v36 = vand.u32 127, %v359_v34 }
  0x32   : > { %v634_v8 = vld [vmem:[#allocation5 + $0x48] sm:$0xff]  ;;  %v633_v10 = vld [vmem:[#allocation5 + $0x40] sm:$0xff]  ;;  %v627_v15 = vld [vmem:[#allocation5 + $0x10] sm:$0xff]  ;;  %vm368_vm4 = vcmask 130048   ;;  %s849_s20 = smov 64   ;;  %s637_s8 = sshll.u32 %s888_s13, 4 }
  0x33   : > { %v297_v5 = vsel %vm295_vm0, %v612_v4, 0  ;;  %v623_v11 = vld [vmem:[%s968_s14 + $0x4] sm:$0xf]  ;;  %v561_v12 = vld [vmem:[%s968_s14 + $0x8] sm:$0xf0]  ;;  %vm364_vm3 = vcmp.le.s32.totalorder %v363_v36, %v360_v35  ;;  %v361_v41 = vadd.s32 8, %v360_v35  ;;  %s458_s19 = scalar_lea.hbm %s1028_s2, %s637_s8 }
  0x34   : > { %317 = vmatpush.bf16.msra.mxu1 %v297_v5  ;;  %300 = vmatpush.bf16.msra.mxu0 %v631_v3  ;;  %v564_v14 = vor.u32 %v623_v11, %v561_v12  ;;  %v626_v16 = vld [vmem:[#allocation5 + $0x8] sm:$0xff]  ;;  %v625_v17 = vld [vmem:[#allocation5] sm:$0xff]  ;;  %s181_s21 = scalar_lea.vmem [#allocation7], %s554_s6  ;;  %s461_s24 = sshll.u32 %s458_s19, 4  ;;  %s462_s24 = int_to_ptr.hbm [resolvable:$true] %s461_s24 }
  0x35   : > { %v559_v18 = vld [vmem:[%s968_s14] sm:$0xf]  ;;  %v624_v19 = vld [vmem:[%s968_s14 + $0x4] sm:$0xf0]  ;;  %vm365_vm5 = vcmp.le.s32.totalorder %v363_v36, %v361_v41  ;;  %s459_s22 = sshll.u32 %s181_s21, 4  ;;  %s447_s25 = scalar_lea.sflag [#allocation4], %s962_s5  ;;  %s460_s22 = int_to_ptr.vmem [resolvable:$true] %s459_s22 }
  0x36   : > { %v560_v20 = vor.u32 %v624_v19, %v559_v18  ;;  %s785_s26 = sshra.s32 %s462_s24, 4  ;;  %s791_s30 = scalar_lea.hbm %s1028_s2, 32  ;;  %s786_s26 = int_to_ptr.hbm [resolvable:$true] %s785_s26 }
  0x37   : > { %s787_s13 = scalar_lea.hbm %s786_s26, 16  ;;  %p792_p11 = scmp.lt.s32.totalorder %s786_s26, %s1028_s2 }
  0x38   : > { %318 = vmatpush.bf16.msra.mxu1 %v635_v6  ;;  %301 = vmatpush.bf16.msra.mxu0 %v630_v7  ;;  %p788_p1 = scmp.ne.s32.totalorder %s786_s26, %s787_s13  ;;  %p793_p9 = scmp.lt.s32.totalorder %s791_s30, %s787_s13 }
  0x3a   : > { %p789_p4 = pnand %p788_p1, %p934_p7  ;;  %p794_p2 = por %p793_p9, %p792_p11 }
  0x3c   : > { %319 = vmatpush.bf16.msra.mxu1 %v634_v8  ;;  %302 = vmatpush.bf16.msra.mxu0 %v629_v9  ;;  %p790_p8 = pneg %p789_p4 }
  0x3e   : > { %p795_p10 = pnand %p794_p2, %p790_p8 }
  0x40   : > { %320 = vmatpush.bf16.msra.mxu1 %v633_v10  ;;  %303 = vmatpush.bf16.msra.mxu0 %v628_v13 }
  0x43   : > { %613 = vmatmul.msk.bf16.vlgmr.msra.gmra.mxu1 %vm291_vm1, %v564_v14 }
  0x44   : > { %304 = vmatpush.bf16.msra.mxu0 %v627_v15 }
  0x48   : > { %305 = vmatpush.bf16.msra.mxu0 %v626_v16 }
  0x4c   : > { %306 = vmatpush.bf16.msra.mxu0 %v625_v17 }
  0x4f   : > { %307 = vmatmul.bf16.vlgmr.msra.gmra.mxu0 %v560_v20 }
  0xc0   : > { %v322_v21 = vpop.f32.mrf.mxu1 }
  0xc8   : > { %v324_v24 = vpop.f32.mrf.mxu1 }
  0xcc   : > { %v308_v22 = vpop.f32.mrf.mxu0 }
  0xcd   : > { %v323_v23 = vadd.f32 %v322_v21, %v308_v22 }
  0xcf   : > { %v327_v26 = vpack.c.bf16 %v323_v23, %v323_v23 }
  0xd1   : > { %v331_v29 = vunpack.c.l.b16 %v327_v26 }
  0xd4   : > { %v310_v25 = vpop.f32.mrf.mxu0 }
  0xd5   : > { %v325_v27 = vadd.f32 %v324_v24, %v310_v25 }
  0xd7   : > { %v328_v28 = vpack.c.bf16 %v325_v27, %v325_v27 }
  0xd9   : > { %v332_v30 = vunpack.c.l.b16 %v328_v28 }
  0xdb   : > { %v333_v31 = vpack.c.b16 %v332_v30, %v331_v29 }
  0xdd   : > { %334 = vrot.lane.b32.xlu0 %v333_v31, %s848_s15 }
 0x14f   : > { %v335_v32 = vpop.permute.xlu0 %334 }
 0x150   : > { %v341_v33 = vsel %vm336_vm2, %v335_v32, 0 }
 0x151   : > { %350 = vmatpush.bf16.xpose.msra.mxu2 %v341_v33 }
 0x158   : > { %614 = vmatmul.msk.bf16.vlgmr.msra.gmra.mxu2 %vm336_vm2, %v333_v31 }
 0x1db   : > { %v352_v37 = vpop.f32.mrf.mxu2 }
 0x1dc   : > { %v357_v38 = vmul.f32 0.17677669, %v352_v37 }
 0x1de   : > { %v366_v39 = vsel %vm364_vm3, %v357_v38, -inf }
 0x1df   : > { %v369_v40 = vsel %vm368_vm4, %v366_v39, -inf }
 0x1e0   : > { %370 = vmax.xlane.f32.xlu0 %v369_v40 }
 0x1e3   : > { %v354_v42 = vpop.f32.mrf.mxu2 }
 0x1e4   : > { %v358_v43 = vmul.f32 0.17677669, %v354_v42 }
 0x1e6   : > { %v367_v44 = vsel %vm365_vm5, %v358_v43, -inf }
 0x1e7   : > { %v372_v45 = vsel %vm368_vm4, %v367_v44, -inf }
 0x1e8   : > { %373 = vmax.xlane.f32.xlu1 %v372_v45 }
 0x253   : > { %v371_v46 = vpop.xlane.xlu0 %370 }
 0x254   : > { %v375_v47 = vsub.f32 %v366_v39, %v371_v46 }
 0x256   : > { %v377_v48 = vmul.f32 1.442695, %v375_v47 }
 0x258   : > { %703 = vpow2.f32 %v377_v48 }
 0x25b   : > { %v374_v49 = vpop.xlane.xlu1 %373 }
 0x25c   : > { %v376_v50 = vsub.f32 %v367_v44, %v374_v49 }
 0x25e   : > { %v704_v51 = vpop.eup %703  ;;  %v379_v52 = vmul.f32 1.442695, %v376_v50 }
 0x25f   : > { %v381_v53 = vsel %vm368_vm4, %v704_v51, 0.0 }
 0x260   : > { %705 = vpow2.f32 %v379_v52  ;;  %382 = vadd.xlane.f32.xlu1 %v381_v53 }
 0x266   : > { %v706_v54 = vpop.eup %705 }
 0x267   : > { %v384_v55 = vsel %vm368_vm4, %v706_v54, 0.0 }
 0x268   : > { %385 = vadd.xlane.f32.xlu2 %v384_v55 }
 0x280   : > { %424 = vrot.lane.b32.xlu2 %v333_v31, %s849_s20 }
 0x2d3   : > { %v383_v56 = vpop.xlane.xlu1 %382 }
 0x2d4   : > { %707 = vrcp.f32 %v383_v56  ;;  %v398_v62 = vand.u32 2147483648, %v383_v56  ;;  %vm392_vm7 = vweird.f32 %v383_v56  ;;  %v396_v0 = vand.u32 2147483647, %v383_v56 }
 0x2d6   : > { %v399_v5 = vor.u32 1.1754944e-38, %v398_v62  ;;  %vm397_vm9 = vcmp.eq.f32.partialorder %v396_v0, 8.507059e+37 }
 0x2da   : > { %v708_v57 = vpop.eup %707 }
 0x2db   : > { %v388_v58 = vmul.f32 %v708_v57, %v383_v56  ;;  %v386_v59 = vpop.xlane.xlu2 %385  ;;  %vm393_vm6 = vweird.f32 %v708_v57 }
 0x2dc   : > { %709 = vrcp.f32 %v386_v59  ;;  %vm394_vm8 = vmor %vm392_vm7, %vm393_vm6  ;;  %v412_v7 = vand.u32 2147483648, %v386_v59  ;;  %v410_v10 = vand.u32 2147483647, %v386_v59  ;;  %vm406_vm11 = vweird.f32 %v386_v59 }
 0x2dd   : > { %v389_v60 = vsub.f32 1.0, %v388_v58 }
 0x2de   : > { %v413_v13 = vor.u32 1.1754944e-38, %v412_v7  ;;  %vm411_vm13 = vcmp.eq.f32.partialorder %v410_v10, 8.507059e+37 }
 0x2df   : > { %v390_v61 = vmul.f32 %v708_v57, %v389_v60 }
 0x2e1   : > { %v391_v63 = vadd.f32 %v708_v57, %v390_v61 }
 0x2e2   : > { %v710_v1 = vpop.eup %709 }
 0x2e3   : > { %v395_v2 = vsel %vm394_vm8, %v708_v57, %v391_v63  ;;  %v402_v3 = vmul.f32 %v710_v1, %v386_v59  ;;  %v425_v4 = vpop.permute.xlu2 %424  ;;  %vm407_vm10 = vweird.f32 %v710_v1 }
 0x2e4   : > { %437 = vmatpush.bf16.msra.mxu3 %v425_v4  ;;  %v400_v8 = vsel %vm397_vm9, %v399_v5, %v395_v2  ;;  %vm408_vm12 = vmor %vm406_vm11, %vm407_vm10 }
 0x2e5   : > { %v403_v6 = vsub.f32 1.0, %v402_v3  ;;  %v415_v12 = vmul.f32 %v704_v51, %v400_v8 }
 0x2e7   : > { %v404_v9 = vmul.f32 %v710_v1, %v403_v6  ;;  %v417_v17 = vpack.c.bf16 %v415_v12, %v415_v12 }
 0x2e9   : > { %v405_v11 = vadd.f32 %v710_v1, %v404_v9  ;;  %v421_v19 = vunpack.c.l.b16 %v417_v17 }
 0x2eb   : > { %v409_v14 = vsel %vm408_vm12, %v710_v1, %v405_v11 }
 0x2ec   : > { %v414_v15 = vsel %vm411_vm13, %v413_v13, %v409_v14 }
 0x2ed   : > { %v416_v16 = vmul.f32 %v706_v54, %v414_v15 }
 0x2ef   : > { %v418_v18 = vpack.c.bf16 %v416_v16, %v416_v16 }
 0x2f1   : > { %v422_v20 = vunpack.c.l.b16 %v418_v18 }
 0x2f3   : > { %v423_v21 = vpack.c.b16 %v422_v20, %v421_v19 }
 0x2f5   : > { %615 = vmatmul.msk.bf16.vlgmr.msra.gmra.mxu3 %vm368_vm4, %v423_v21 }
 0x378   : > { %v439_v22 = vpop.f32.mrf.mxu3 }
 0x379   : > { %444 = vst.msk [vmem:[%s181_s21] sm:$0xff] %vm336_vm2, %v439_v22 }
 0x380   : > { %v441_v23 = vpop.f32.mrf.mxu3 }
 0x381   : > { %445 = vst.msk [vmem:[%s181_s21 + $0x8] sm:$0xff] %vm336_vm2, %v441_v23 }
 0x382   : > { %798 = shalt.err (!%p795_p10)
}
 0x383   : > { %s850_s5 = smov 128   ;;  %s851_s7 = smov 8  }
 0x384   : > { %644 = dma.vmem_to_hbm [thread:$0]  (%p934_p7), %s460_s22, 256, %s462_s24, %s447_s25, %s850_s5, %s850_s5, %s851_s7  }
 0x385 PF: > { %s476_s14 = sand.u32 1, %s829_s9   ;;  %p1034_p12 = scmp.ge.s32.totalorder %s841_s12, 2 }
 0x386   : > { %s477_s15 = scalar_lea.sflag [#allocation4], %s476_s14 }
 0x387   : > { %p655_p13 = pnand %p1034_p12, %p902_p6 }
 0x389   : > { %p656_p0 = pneg %p655_p13 }
 0x38b   : > { %824 = dma.done.wait (%p656_p0), %s477_s15, 256  }
 0x38c   : > { %826 = vsyncadd (%p656_p0), %s477_s15, 4294967040  ;;  %p16_p3 = scmp.ge.s32.totalorder %s920_s23, 4   ;;  %s1035_s9 = smov %s833_s10 }
 0x38d   : > { %s1036_s10 = smov %s837_s11  ;;  %s1037_s11 = smov %s930_s28 }
 0x38e   : > { %s1038_s12 = smov %s920_s23  ;;  %18 = sbr.rel (!%p16_p3) target bundleno = 6 (0x6), region = 77 }
 0x393   :  { %483 = vsyncpa [#allocation3], 1 }
 0x394   :  { %485 = vsyncpa [#allocation3 + $0x1], 1 }
 0x395   :  { %486 = vsyncpa [#allocation6], 1 }
 0x396   :  { %487 = vsyncpa [#allocation4], 1 }
 0x397   :  { %489 = vsyncpa [#allocation4 + $0x1], 1 }

</bundles_post_ra>
